<compile_context>
chip_gen: v7x
topology: tpu7x:2x2x1
jax: 0.10.0
libtpu: 0.0.40
codegen_flags: <defaults>
</compile_context>

<pallas_src>
import functools

import jax
import jax.numpy as jnp
import numpy as np
from jax import lax
from jax.experimental import pallas as pl
from jax.experimental.pallas import tpu as pltpu


def _cdiv(a, b):
    return -(-a // b)


def _round_up(a, b):
    return _cdiv(a, b) * b


def _primary_caps_kernel(x_ref, w_ref, b_ref, sel_ref, selt_ref, o_ref, *,
                         wh, m_rows, n_pad):
    # Fused 3x3 / stride-2 conv: the 9 taps collapse into 4 (dr, dc) shift
    # groups; each group is one bf16 MXU matmul over a statically shifted *ref*
    # window of the space-to-depth block (no materialised shifted copies).
    acc = jnp.zeros((m_rows, n_pad), jnp.float32)
    for s in range(4):
        dr, dc = s // 2, s % 2
        shift = dr * wh + dc                                  # static Python int
        xt = x_ref[pl.ds(shift, m_rows), :]                   # (m_rows, 4*C_in) bf16
        acc = acc + jnp.dot(xt, w_ref[s], preferred_element_type=jnp.float32)
    acc = acc + b_ref[...]                                    # (1, n_pad) f32 broadcast

    # Vectorised squash: per-capsule squared norms via a constant 0/1 selection
    # matmul (bf16 MXU), scale broadcast back with its transpose, ONE dense store.
    sq = (acc * acc).astype(jnp.bfloat16)
    sqn = jnp.dot(sq, sel_ref[...], preferred_element_type=jnp.float32)   # (m, C_out)
    # squash scale = |v| / (|v|^2 + 1); the reciprocal goes to the EUP slot.
    scale = jnp.sqrt(sqn) * pl.reciprocal(sqn + 1.0, approx=True)
    scale_full = jnp.dot(scale.astype(jnp.bfloat16), selt_ref[...],
                         preferred_element_type=jnp.float32)              # (m, n_pad)
    o_ref[...] = (acc * scale_full).astype(o_ref.dtype)


def fast_primary_layer(x, weights, biases, *, stride=2, target_rows=512, min_steps=4):
    """x: (B, C_in, H, W) NCHW; weights: (D, C_out, C_in, 3, 3); biases: (D, C_out).

    Returns (B, C_out*H_out*W_out, D), matching the PyTorch module's forward.
    """
    B, C_in, H, W = x.shape
    D, C_out = weights.shape[0], weights.shape[1]
    ksz = weights.shape[-1]
    if ksz != 3 or stride != 2:
        raise NotImplementedError("kernel specialised to the module's 3x3 / stride-2 conv")
    if H < ksz or W < ksz:
        raise ValueError("spatial dims must be >= kernel size")

    H_out = (H - ksz) // stride + 1
    W_out = (W - ksz) // stride + 1
    N = C_out * D
    N_pad = _round_up(max(N, 128), 128)            # lane-dense output width

    # Pad odd spatial dims to even; the extra grid positions are cropped below.
    Hp, Wp = _round_up(H, 2), _round_up(W, 2)
    if (Hp, Wp) != (H, W):
        x = jnp.pad(x, ((0, 0), (0, 0), (0, Hp - H), (0, Wp - W)))
    Hh, Wh = Hp // 2, Wp // 2
    Kc = 4 * C_in

    # ---- 1x space-to-depth relayout of x (bf16): rows = (b, i, j) on the
    # stride-2 grid, cols = (ph, pw, c_in).  Replaces the 2.25x im2col.
    xs = x.astype(jnp.bfloat16).reshape(B, C_in, Hh, 2, Wh, 2)
    xs = xs.transpose(0, 2, 4, 3, 5, 1).reshape(B * Hh * Wh, Kc)

    # ---- row tiling over the flattened (batch, grid-row) axis ----
    rows_per_img = Hh * Wh
    total_rows = B * rows_per_img
    halo = Wh + 1                                  # largest in-kernel row shift
    R = max(8, min(_round_up(total_rows, 8), (target_rows // 8) * 8))
    if _cdiv(total_rows, R) < min_steps:           # keep both v7x cores busy / pipelined
        R = max(8, _round_up(_cdiv(total_rows, min_steps), 8))
    n_tiles = _cdiv(total_rows, R)
    halo_pad = _round_up(R + halo, 16) - R         # bf16 sublane-tile friendly

    xs = jnp.pad(xs, ((0, n_tiles * R + halo_pad - total_rows), (0, 0)))
    # Overlapping row windows (tile body + halo); duplication overhead ~halo/R.
    # Outputs whose reads cross an image boundary are cropped afterwards.
    idx = (jnp.arange(n_tiles, dtype=jnp.int32)[:, None] * R
           + jnp.arange(R + halo_pad, dtype=jnp.int32)[None, :])
    xs_tiled = jnp.take(xs, idx, axis=0)           # (n_tiles, R + halo_pad, Kc)

    # ---- fold the 9 taps x D convs into 4 bf16 shift-group weight slabs ----
    # w_sh[dr*2+dc, ph*2*C_in + pw*C_in + c, co*D + d] = weights[d, co, c, 2dr+ph, 2dc+pw]
    wt = jnp.transpose(weights.astype(jnp.float32), (3, 4, 2, 1, 0)).reshape(3, 3, C_in, N)
    wt = jnp.pad(wt, ((0, 1), (0, 1), (0, 0), (0, N_pad - N)))   # kh==3 / kw==3 taps are 0
    w_sh = wt.reshape(2, 2, 2, 2, C_in, N_pad).transpose(0, 2, 1, 3, 4, 5)
    w_sh = w_sh.reshape(4, Kc, N_pad).astype(jnp.bfloat16)
    b_all = jnp.pad(jnp.transpose(biases.astype(jnp.float32)).reshape(1, N),
                    ((0, 0), (0, N_pad - N)))

    # Constant 0/1 capsule-selection matrices (exact in bf16), built once here.
    col = jnp.arange(N_pad)
    sel = ((col[:, None] // D == jnp.arange(C_out)[None, :]) &
           (col[:, None] < N)).astype(jnp.bfloat16)               # (N_pad, C_out)
    sel_t = sel.T                                                 # (C_out, N_pad)

    kernel = functools.partial(_primary_caps_kernel, wh=Wh, m_rows=R, n_pad=N_pad)

    def _run(single_buffer_consts):
        def cspec(shape, imap):
            if single_buffer_consts:
                return pl.BlockSpec(shape, imap, pipeline_mode=pl.Buffered(1))
            return pl.BlockSpec(shape, imap)
        return pl.pallas_call(
            kernel,
            out_shape=jax.ShapeDtypeStruct((n_tiles, R, N_pad), jnp.float32),
            grid_spec=pltpu.PrefetchScalarGridSpec(
                num_scalar_prefetch=0,
                grid=(n_tiles,),
                in_specs=[
                    pl.BlockSpec((None, R + halo_pad, Kc), lambda t: (t, 0, 0)),
                    # constant-index blocks: never re-DMA'd per step
                    cspec((4, Kc, N_pad), lambda t: (0, 0, 0)),
                    cspec((1, N_pad), lambda t: (0, 0)),
                    cspec((N_pad, C_out), lambda t: (0, 0)),
                    cspec((C_out, N_pad), lambda t: (0, 0)),
                ],
                out_specs=pl.BlockSpec((None, R, N_pad), lambda t: (t, 0, 0)),
            ),
            compiler_params=pltpu.CompilerParams(
                dimension_semantics=("parallel",),
                vmem_limit_bytes=32 * 1024 * 1024,
            ),
        )(xs_tiled, w_sh, b_all, sel, sel_t)

    try:
        # Single-buffer the constant weight/bias/selection blocks (VMEM saving).
        out = _run(True)
    except Exception:       # fallback if this build does not plumb pipeline_mode
        out = _run(False)

    # Drop row padding, padded lanes, and the edge rows/cols a VALID 3x3 conv
    # does not produce; then reorder (small) to the PyTorch layout.
    out = out.reshape(n_tiles * R, N_pad)[:total_rows, :N]
    out = out.reshape(B, Hh, Wh, C_out, D)[:, :H_out, :W_out]
    out = out.transpose(0, 3, 1, 2, 4)             # (B, C_out, H_out, W_out, D)
    return out.reshape(B, C_out * H_out * W_out, D)


def _reference(x, weights, biases, *, stride=2):
    """Pure-JAX reference matching the PyTorch forward (f32)."""
    D = weights.shape[0]
    B = x.shape[0]
    outs = []
    for d in range(D):
        y = lax.conv_general_dilated(
            x, weights[d], window_strides=(stride, stride), padding="VALID",
            dimension_numbers=("NCHW", "OIHW", "NCHW"),
            precision=lax.Precision.HIGHEST,
        ) + biases[d][None, :, None, None]
        outs.append(y.reshape(B, -1, 1))
    v = jnp.concatenate(outs, axis=-1)             # (B, C_out*H_out*W_out, D)
    sqn = jnp.sum(v * v, axis=-1, keepdims=True)
    return sqn / (sqn + 1.0) * v / jnp.sqrt(sqn)


if __name__ == "__main__":
    B, C_in, H, W = 2, 4, 16, 16
    C_out, D, stride = 8, 4, 2

    key = jax.random.PRNGKey(0)
    kx, kw, kb = jax.random.split(key, 3)
    x = jax.random.normal(kx, (B, C_in, H, W), dtype=jnp.float32)
    weights = 0.1 * jax.random.normal(kw, (D, C_out, C_in, 3, 3), dtype=jnp.float32)
    biases = 0.1 * jax.random.normal(kb, (D, C_out), dtype=jnp.float32)

    out = jax.block_until_ready(fast_primary_layer(x, weights, biases, stride=stride))
    ref = jax.block_until_ready(_reference(x, weights, biases, stride=stride))
    assert out.shape == ref.shape, (out.shape, ref.shape)
    # bf16 MXU operands + approximate reciprocal -> looser than the pure-f32 reference.
    np.testing.assert_allclose(np.asarray(out), np.asarray(ref), rtol=2e-2, atol=1e-2)
    print("KERNEL_OK")
</pallas_src>

<mosaic_0001>
module attributes {stable_mosaic.version = 11 : i64} {
  func.func @_primary_caps_kernel(%arg0: i32, %arg1: memref<1x48x16xbf16, #tpu.memory_space<vmem>>, %arg2: memref<4x16x128xbf16, #tpu.memory_space<vmem>>, %arg3: memref<1x128xf32, #tpu.memory_space<vmem>>, %arg4: memref<128x8xbf16, #tpu.memory_space<vmem>>, %arg5: memref<8x128xbf16, #tpu.memory_space<vmem>>, %arg6: memref<1x32x128xf32, #tpu.memory_space<vmem>>) attributes {dimension_semantics = [#tpu.dimension_semantics<parallel>], iteration_bounds = array<i64: 4>, scalar_prefetch = 0 : i64, scratch_operands = 0 : i64, tpu.core_type = #tpu.core_type<tc>, window_params = [{transform_indices = @transform_0, window_bounds = array<i64: 1, 48, 16>}, {pipeline_mode = #tpu.pipeline_mode<synchronous>, transform_indices = @transform_1, window_bounds = array<i64: 4, 16, 128>}, {pipeline_mode = #tpu.pipeline_mode<synchronous>, transform_indices = @transform_2, window_bounds = array<i64: 1, 128>}, {pipeline_mode = #tpu.pipeline_mode<synchronous>, transform_indices = @transform_3, window_bounds = array<i64: 128, 8>}, {pipeline_mode = #tpu.pipeline_mode<synchronous>, transform_indices = @transform_4, window_bounds = array<i64: 8, 128>}, {transform_indices = @transform_5, window_bounds = array<i64: 1, 32, 128>}]} {
    %cst = arith.constant 0.000000e+00 : f32
    %0 = vector.broadcast %cst : f32 to vector<32x128xf32>
    %c0 = arith.constant 0 : index
    %c0_0 = arith.constant 0 : index
    %c0_1 = arith.constant 0 : index
    %1 = vector.load %arg1[%c0, %c0_0, %c0_1] : memref<1x48x16xbf16, #tpu.memory_space<vmem>>, vector<1x32x16xbf16>
    %2 = vector.shape_cast %1 : vector<1x32x16xbf16> to vector<32x16xbf16>
    %c0_2 = arith.constant 0 : index
    %c0_3 = arith.constant 0 : index
    %c0_4 = arith.constant 0 : index
    %3 = vector.load %arg2[%c0_2, %c0_3, %c0_4] : memref<4x16x128xbf16, #tpu.memory_space<vmem>>, vector<1x16x128xbf16>
    %4 = vector.shape_cast %3 : vector<1x16x128xbf16> to vector<16x128xbf16>
    %cst_5 = arith.constant dense<0.000000e+00> : vector<32x128xf32>
    %5 = tpu.matmul %2, %4, %cst_5 {dimension_numbers = #tpu.dot_dimension_numbers<[1], [0], [0], [1], [0, 0, 1, 1], [], []>} : vector<32x16xbf16>, vector<16x128xbf16>, vector<32x128xf32> -> vector<32x128xf32>
    %6 = arith.addf %0, %5 : vector<32x128xf32>
    %c0_6 = arith.constant 0 : index
    %c1 = arith.constant 1 : index
    %c0_7 = arith.constant 0 : index
    %7 = vector.load %arg1[%c0_6, %c1, %c0_7] : memref<1x48x16xbf16, #tpu.memory_space<vmem>>, vector<1x32x16xbf16>
    %8 = vector.shape_cast %7 : vector<1x32x16xbf16> to vector<32x16xbf16>
    %c1_8 = arith.constant 1 : index
    %c0_9 = arith.constant 0 : index
    %c0_10 = arith.constant 0 : index
    %9 = vector.load %arg2[%c1_8, %c0_9, %c0_10] : memref<4x16x128xbf16, #tpu.memory_space<vmem>>, vector<1x16x128xbf16>
    %10 = vector.shape_cast %9 : vector<1x16x128xbf16> to vector<16x128xbf16>
    %cst_11 = arith.constant dense<0.000000e+00> : vector<32x128xf32>
    %11 = tpu.matmul %8, %10, %cst_11 {dimension_numbers = #tpu.dot_dimension_numbers<[1], [0], [0], [1], [0, 0, 1, 1], [], []>} : vector<32x16xbf16>, vector<16x128xbf16>, vector<32x128xf32> -> vector<32x128xf32>
    %12 = arith.addf %6, %11 : vector<32x128xf32>
    %c0_12 = arith.constant 0 : index
    %c8 = arith.constant 8 : index
    %c0_13 = arith.constant 0 : index
    %13 = vector.load %arg1[%c0_12, %c8, %c0_13] : memref<1x48x16xbf16, #tpu.memory_space<vmem>>, vector<1x32x16xbf16>
    %14 = vector.shape_cast %13 : vector<1x32x16xbf16> to vector<32x16xbf16>
    %c2 = arith.constant 2 : index
    %c0_14 = arith.constant 0 : index
    %c0_15 = arith.constant 0 : index
    %15 = vector.load %arg2[%c2, %c0_14, %c0_15] : memref<4x16x128xbf16, #tpu.memory_space<vmem>>, vector<1x16x128xbf16>
    %16 = vector.shape_cast %15 : vector<1x16x128xbf16> to vector<16x128xbf16>
    %cst_16 = arith.constant dense<0.000000e+00> : vector<32x128xf32>
    %17 = tpu.matmul %14, %16, %cst_16 {dimension_numbers = #tpu.dot_dimension_numbers<[1], [0], [0], [1], [0, 0, 1, 1], [], []>} : vector<32x16xbf16>, vector<16x128xbf16>, vector<32x128xf32> -> vector<32x128xf32>
    %18 = arith.addf %12, %17 : vector<32x128xf32>
    %c0_17 = arith.constant 0 : index
    %c9 = arith.constant 9 : index
    %c0_18 = arith.constant 0 : index
    %19 = vector.load %arg1[%c0_17, %c9, %c0_18] : memref<1x48x16xbf16, #tpu.memory_space<vmem>>, vector<1x32x16xbf16>
    %20 = vector.shape_cast %19 : vector<1x32x16xbf16> to vector<32x16xbf16>
    %c3 = arith.constant 3 : index
    %c0_19 = arith.constant 0 : index
    %c0_20 = arith.constant 0 : index
    %21 = vector.load %arg2[%c3, %c0_19, %c0_20] : memref<4x16x128xbf16, #tpu.memory_space<vmem>>, vector<1x16x128xbf16>
    %22 = vector.shape_cast %21 : vector<1x16x128xbf16> to vector<16x128xbf16>
    %cst_21 = arith.constant dense<0.000000e+00> : vector<32x128xf32>
    %23 = tpu.matmul %20, %22, %cst_21 {dimension_numbers = #tpu.dot_dimension_numbers<[1], [0], [0], [1], [0, 0, 1, 1], [], []>} : vector<32x16xbf16>, vector<16x128xbf16>, vector<32x128xf32> -> vector<32x128xf32>
    %24 = arith.addf %18, %23 : vector<32x128xf32>
    %c0_22 = arith.constant 0 : index
    %c0_23 = arith.constant 0 : index
    %25 = vector.load %arg3[%c0_22, %c0_23] : memref<1x128xf32, #tpu.memory_space<vmem>>, vector<1x128xf32>
    %26 = vector.broadcast %25 : vector<1x128xf32> to vector<32x128xf32>
    %27 = arith.addf %24, %26 : vector<32x128xf32>
    %28 = arith.mulf %27, %27 : vector<32x128xf32>
    %29 = arith.truncf %28 : vector<32x128xf32> to vector<32x128xbf16>
    %c0_24 = arith.constant 0 : index
    %c0_25 = arith.constant 0 : index
    %30 = vector.load %arg4[%c0_24, %c0_25] : memref<128x8xbf16, #tpu.memory_space<vmem>>, vector<128x8xbf16>
    %cst_26 = arith.constant dense<0.000000e+00> : vector<32x8xf32>
    %31 = tpu.matmul %29, %30, %cst_26 {dimension_numbers = #tpu.dot_dimension_numbers<[1], [0], [0], [1], [0, 0, 1, 1], [], []>} : vector<32x128xbf16>, vector<128x8xbf16>, vector<32x8xf32> -> vector<32x8xf32>
    %32 = math.sqrt %31 : vector<32x8xf32>
    %cst_27 = arith.constant 1.000000e+00 : f32
    %33 = vector.broadcast %cst_27 : f32 to vector<32x8xf32>
    %34 = arith.addf %31, %33 : vector<32x8xf32>
    %35 = tpu.reciprocal %34 {approx = true} : vector<32x8xf32> -> vector<32x8xf32>
    %36 = arith.mulf %32, %35 : vector<32x8xf32>
    %37 = arith.truncf %36 : vector<32x8xf32> to vector<32x8xbf16>
    %c0_28 = arith.constant 0 : index
    %c0_29 = arith.constant 0 : index
    %38 = vector.load %arg5[%c0_28, %c0_29] : memref<8x128xbf16, #tpu.memory_space<vmem>>, vector<8x128xbf16>
    %cst_30 = arith.constant dense<0.000000e+00> : vector<32x128xf32>
    %39 = tpu.matmul %37, %38, %cst_30 {dimension_numbers = #tpu.dot_dimension_numbers<[1], [0], [0], [1], [0, 0, 1, 1], [], []>} : vector<32x8xbf16>, vector<8x128xbf16>, vector<32x128xf32> -> vector<32x128xf32>
    %40 = arith.mulf %27, %39 : vector<32x128xf32>
    %c0_31 = arith.constant 0 : index
    %c0_32 = arith.constant 0 : index
    %c0_33 = arith.constant 0 : index
    %41 = vector.load %arg6[%c0_31, %c0_32, %c0_33] : memref<1x32x128xf32, #tpu.memory_space<vmem>>, vector<1x32x128xf32>
    %42 = vector.shape_cast %41 : vector<1x32x128xf32> to vector<32x128xf32>
    %43 = vector.shape_cast %40 : vector<32x128xf32> to vector<1x32x128xf32>
    tpu.vector_store %arg6[%c0_31, %c0_32, %c0_33], %43 {strides = array<i32>} : memref<1x32x128xf32, #tpu.memory_space<vmem>>, vector<1x32x128xf32>,
    return
  }
  func.func @transform_0(%arg0: i32) -> (i32, i32, i32) {
    %c0_i32 = arith.constant 0 : i32
    %c0_i32_0 = arith.constant 0 : i32
    %c0_i32_1 = arith.constant 0 : i32
    return %arg0, %c0_i32, %c0_i32_0 : i32, i32, i32
  }
  func.func @transform_1(%arg0: i32) -> (i32, i32, i32) {
    %c0_i32 = arith.constant 0 : i32
    %c0_i32_0 = arith.constant 0 : i32
    %c0_i32_1 = arith.constant 0 : i32
    %c0_i32_2 = arith.constant 0 : i32
    return %c0_i32, %c0_i32_0, %c0_i32_1 : i32, i32, i32
  }
  func.func @transform_2(%arg0: i32) -> (i32, i32) {
    %c0_i32 = arith.constant 0 : i32
    %c0_i32_0 = arith.constant 0 : i32
    %c0_i32_1 = arith.constant 0 : i32
    return %c0_i32, %c0_i32_0 : i32, i32
  }
  func.func @transform_3(%arg0: i32) -> (i32, i32) {
    %c0_i32 = arith.constant 0 : i32
    %c0_i32_0 = arith.constant 0 : i32
    %c0_i32_1 = arith.constant 0 : i32
    return %c0_i32, %c0_i32_0 : i32, i32
  }
  func.func @transform_4(%arg0: i32) -> (i32, i32) {
    %c0_i32 = arith.constant 0 : i32
    %c0_i32_0 = arith.constant 0 : i32
    %c0_i32_1 = arith.constant 0 : i32
    return %c0_i32, %c0_i32_0 : i32, i32
  }
  func.func @transform_5(%arg0: i32) -> (i32, i32, i32) {
    %c0_i32 = arith.constant 0 : i32
    %c0_i32_0 = arith.constant 0 : i32
    %c0_i32_1 = arith.constant 0 : i32
    return %arg0, %c0_i32, %c0_i32_0 : i32, i32, i32
  }
}

module attributes {stable_mosaic.version = 11 : i64} {
  func.func @_primary_caps_kernel(%arg0: i32, %arg1: memref<1x48x16xbf16, #tpu.memory_space<vmem>>, %arg2: memref<4x16x128xbf16, #tpu.memory_space<vmem>>, %arg3: memref<1x128xf32, #tpu.memory_space<vmem>>, %arg4: memref<128x8xbf16, #tpu.memory_space<vmem>>, %arg5: memref<8x128xbf16, #tpu.memory_space<vmem>>, %arg6: memref<1x32x128xf32, #tpu.memory_space<vmem>>) attributes {dimension_semantics = [#tpu.dimension_semantics<parallel>], iteration_bounds = array<i64: 4>, scalar_prefetch = 0 : i64, scratch_operands = 0 : i64, tpu.core_type = #tpu.core_type<tc>, window_params = [{transform_indices = @transform_0, window_bounds = array<i64: 1, 48, 16>}, {pipeline_mode = #tpu.pipeline_mode<synchronous>, transform_indices = @transform_1, window_bounds = array<i64: 4, 16, 128>}, {pipeline_mode = #tpu.pipeline_mode<synchronous>, transform_indices = @transform_2, window_bounds = array<i64: 1, 128>}, {pipeline_mode = #tpu.pipeline_mode<synchronous>, transform_indices = @transform_3, window_bounds = array<i64: 128, 8>}, {pipeline_mode = #tpu.pipeline_mode<synchronous>, transform_indices = @transform_4, window_bounds = array<i64: 8, 128>}, {transform_indices = @transform_5, window_bounds = array<i64: 1, 32, 128>}]} {
    %cst = arith.constant 0.000000e+00 : f32
    %0 = vector.broadcast %cst : f32 to vector<32x128xf32>
    %c0 = arith.constant 0 : index
    %c0_0 = arith.constant 0 : index
    %c0_1 = arith.constant 0 : index
    %1 = vector.load %arg1[%c0, %c0_0, %c0_1] : memref<1x48x16xbf16, #tpu.memory_space<vmem>>, vector<1x32x16xbf16>
    %2 = vector.shape_cast %1 : vector<1x32x16xbf16> to vector<32x16xbf16>
    %c0_2 = arith.constant 0 : index
    %c0_3 = arith.constant 0 : index
    %c0_4 = arith.constant 0 : index
    %3 = vector.load %arg2[%c0_2, %c0_3, %c0_4] : memref<4x16x128xbf16, #tpu.memory_space<vmem>>, vector<1x16x128xbf16>
    %4 = vector.shape_cast %3 : vector<1x16x128xbf16> to vector<16x128xbf16>
    %cst_5 = arith.constant dense<0.000000e+00> : vector<32x128xf32>
    %5 = tpu.matmul %2, %4, %cst_5 {dimension_numbers = #tpu.dot_dimension_numbers<[1], [0], [0], [1], [0, 0, 1, 1], [], []>} : vector<32x16xbf16>, vector<16x128xbf16>, vector<32x128xf32> -> vector<32x128xf32>
    %6 = arith.addf %0, %5 : vector<32x128xf32>
    %c0_6 = arith.constant 0 : index
    %c1 = arith.constant 1 : index
    %c0_7 = arith.constant 0 : index
    %7 = vector.load %arg1[%c0_6, %c1, %c0_7] : memref<1x48x16xbf16, #tpu.memory_space<vmem>>, vector<1x32x16xbf16>
    %8 = vector.shape_cast %7 : vector<1x32x16xbf16> to vector<32x16xbf16>
    %c1_8 = arith.constant 1 : index
    %c0_9 = arith.constant 0 : index
    %c0_10 = arith.constant 0 : index
    %9 = vector.load %arg2[%c1_8, %c0_9, %c0_10] : memref<4x16x128xbf16, #tpu.memory_space<vmem>>, vector<1x16x128xbf16>
    %10 = vector.shape_cast %9 : vector<1x16x128xbf16> to vector<16x128xbf16>
    %cst_11 = arith.constant dense<0.000000e+00> : vector<32x128xf32>
    %11 = tpu.matmul %8, %10, %cst_11 {dimension_numbers = #tpu.dot_dimension_numbers<[1], [0], [0], [1], [0, 0, 1, 1], [], []>} : vector<32x16xbf16>, vector<16x128xbf16>, vector<32x128xf32> -> vector<32x128xf32>
    %12 = arith.addf %6, %11 : vector<32x128xf32>
    %c0_12 = arith.constant 0 : index
    %c8 = arith.constant 8 : index
    %c0_13 = arith.constant 0 : index
    %13 = vector.load %arg1[%c0_12, %c8, %c0_13] : memref<1x48x16xbf16, #tpu.memory_space<vmem>>, vector<1x32x16xbf16>
    %14 = vector.shape_cast %13 : vector<1x32x16xbf16> to vector<32x16xbf16>
    %c2 = arith.constant 2 : index
    %c0_14 = arith.constant 0 : index
    %c0_15 = arith.constant 0 : index
    %15 = vector.load %arg2[%c2, %c0_14, %c0_15] : memref<4x16x128xbf16, #tpu.memory_space<vmem>>, vector<1x16x128xbf16>
    %16 = vector.shape_cast %15 : vector<1x16x128xbf16> to vector<16x128xbf16>
    %cst_16 = arith.constant dense<0.000000e+00> : vector<32x128xf32>
    %17 = tpu.matmul %14, %16, %cst_16 {dimension_numbers = #tpu.dot_dimension_numbers<[1], [0], [0], [1], [0, 0, 1, 1], [], []>} : vector<32x16xbf16>, vector<16x128xbf16>, vector<32x128xf32> -> vector<32x128xf32>
    %18 = arith.addf %12, %17 : vector<32x128xf32>
    %c0_17 = arith.constant 0 : index
    %c9 = arith.constant 9 : index
    %c0_18 = arith.constant 0 : index
    %19 = vector.load %arg1[%c0_17, %c9, %c0_18] : memref<1x48x16xbf16, #tpu.memory_space<vmem>>, vector<1x32x16xbf16>
    %20 = vector.shape_cast %19 : vector<1x32x16xbf16> to vector<32x16xbf16>
    %c3 = arith.constant 3 : index
    %c0_19 = arith.constant 0 : index
    %c0_20 = arith.constant 0 : index
    %21 = vector.load %arg2[%c3, %c0_19, %c0_20] : memref<4x16x128xbf16, #tpu.memory_space<vmem>>, vector<1x16x128xbf16>
    %22 = vector.shape_cast %21 : vector<1x16x128xbf16> to vector<16x128xbf16>
    %cst_21 = arith.constant dense<0.000000e+00> : vector<32x128xf32>
    %23 = tpu.matmul %20, %22, %cst_21 {dimension_numbers = #tpu.dot_dimension_numbers<[1], [0], [0], [1], [0, 0, 1, 1], [], []>} : vector<32x16xbf16>, vector<16x128xbf16>, vector<32x128xf32> -> vector<32x128xf32>
    %24 = arith.addf %18, %23 : vector<32x128xf32>
    %c0_22 = arith.constant 0 : index
    %c0_23 = arith.constant 0 : index
    %25 = vector.load %arg3[%c0_22, %c0_23] : memref<1x128xf32, #tpu.memory_space<vmem>>, vector<1x128xf32>
    %26 = vector.broadcast %25 : vector<1x128xf32> to vector<32x128xf32>
    %27 = arith.addf %24, %26 : vector<32x128xf32>
    %28 = arith.mulf %27, %27 : vector<32x128xf32>
    %29 = arith.truncf %28 : vector<32x128xf32> to vector<32x128xbf16>
    %c0_24 = arith.constant 0 : index
    %c0_25 = arith.constant 0 : index
    %30 = vector.load %arg4[%c0_24, %c0_25] : memref<128x8xbf16, #tpu.memory_space<vmem>>, vector<128x8xbf16>
    %cst_26 = arith.constant dense<0.000000e+00> : vector<32x8xf32>
    %31 = tpu.matmul %29, %30, %cst_26 {dimension_numbers = #tpu.dot_dimension_numbers<[1], [0], [0], [1], [0, 0, 1, 1], [], []>} : vector<32x128xbf16>, vector<128x8xbf16>, vector<32x8xf32> -> vector<32x8xf32>
    %32 = math.sqrt %31 : vector<32x8xf32>
    %cst_27 = arith.constant 1.000000e+00 : f32
    %33 = vector.broadcast %cst_27 : f32 to vector<32x8xf32>
    %34 = arith.addf %31, %33 : vector<32x8xf32>
    %35 = tpu.reciprocal %34 {approx = true} : vector<32x8xf32> -> vector<32x8xf32>
    %36 = arith.mulf %32, %35 : vector<32x8xf32>
    %37 = arith.truncf %36 : vector<32x8xf32> to vector<32x8xbf16>
    %c0_28 = arith.constant 0 : index
    %c0_29 = arith.constant 0 : index
    %38 = vector.load %arg5[%c0_28, %c0_29] : memref<8x128xbf16, #tpu.memory_space<vmem>>, vector<8x128xbf16>
    %cst_30 = arith.constant dense<0.000000e+00> : vector<32x128xf32>
    %39 = tpu.matmul %37, %38, %cst_30 {dimension_numbers = #tpu.dot_dimension_numbers<[1], [0], [0], [1], [0, 0, 1, 1], [], []>} : vector<32x8xbf16>, vector<8x128xbf16>, vector<32x128xf32> -> vector<32x128xf32>
    %40 = arith.mulf %27, %39 : vector<32x128xf32>
    %c0_31 = arith.constant 0 : index
    %c0_32 = arith.constant 0 : index
    %c0_33 = arith.constant 0 : index
    %41 = vector.load %arg6[%c0_31, %c0_32, %c0_33] : memref<1x32x128xf32, #tpu.memory_space<vmem>>, vector<1x32x128xf32>
    %42 = vector.shape_cast %41 : vector<1x32x128xf32> to vector<32x128xf32>
    %43 = vector.shape_cast %40 : vector<32x128xf32> to vector<1x32x128xf32>
    tpu.vector_store %arg6[%c0_31, %c0_32, %c0_33], %43 {strides = array<i32>} : memref<1x32x128xf32, #tpu.memory_space<vmem>>, vector<1x32x128xf32>,
    return
  }
  func.func @transform_0(%arg0: i32) -> (i32, i32, i32) {
    %c0_i32 = arith.constant 0 : i32
    %c0_i32_0 = arith.constant 0 : i32
    %c0_i32_1 = arith.constant 0 : i32
    return %arg0, %c0_i32, %c0_i32_0 : i32, i32, i32
  }
  func.func @transform_1(%arg0: i32) -> (i32, i32, i32) {
    %c0_i32 = arith.constant 0 : i32
    %c0_i32_0 = arith.constant 0 : i32
    %c0_i32_1 = arith.constant 0 : i32
    %c0_i32_2 = arith.constant 0 : i32
    return %c0_i32, %c0_i32_0, %c0_i32_1 : i32, i32, i32
  }
  func.func @transform_2(%arg0: i32) -> (i32, i32) {
    %c0_i32 = arith.constant 0 : i32
    %c0_i32_0 = arith.constant 0 : i32
    %c0_i32_1 = arith.constant 0 : i32
    return %c0_i32, %c0_i32_0 : i32, i32
  }
  func.func @transform_3(%arg0: i32) -> (i32, i32) {
    %c0_i32 = arith.constant 0 : i32
    %c0_i32_0 = arith.constant 0 : i32
    %c0_i32_1 = arith.constant 0 : i32
    return %c0_i32, %c0_i32_0 : i32, i32
  }
  func.func @transform_4(%arg0: i32) -> (i32, i32) {
    %c0_i32 = arith.constant 0 : i32
    %c0_i32_0 = arith.constant 0 : i32
    %c0_i32_1 = arith.constant 0 : i32
    return %c0_i32, %c0_i32_0 : i32, i32
  }
  func.func @transform_5(%arg0: i32) -> (i32, i32, i32) {
    %c0_i32 = arith.constant 0 : i32
    %c0_i32_0 = arith.constant 0 : i32
    %c0_i32_1 = arith.constant 0 : i32
    return %arg0, %c0_i32, %c0_i32_0 : i32, i32, i32
  }
}

</mosaic_0001>

<bundles_post_ra>
// kernel: tpu_custom_call.1
= control target key start
LH: loop header
LB: loop body
LE: loop exit
PB: predicated region body
PF: predicated region fallthrough
CT: control target
= control target key end

     0   :  { %10 = vsyncpa [#allocation3], 0  ;;  %s1385_s0 = inlined_call_operand.vmem [shape: bf16[4,48,16], index: 0, kind: input, shape index: {}]   ;;  %s1386_s1 = inlined_call_operand.vmem [shape: bf16[4,16,128], index: 1, kind: input, shape index: {}]   ;;  %s1387_s2 = inlined_call_operand.vmem [shape: f32[1,128], index: 2, kind: input, shape index: {}]   ;;  %s1388_s3 = inlined_call_operand.vmem [shape: bf16[128,8], index: 3, kind: input, shape index: {}]   ;;  %s1389_s4 = inlined_call_operand.vmem [shape: bf16[8,128], index: 4, kind: input, shape index: {}]   ;;  %s1390_s5 = inlined_call_operand.hbm [shape: f32[4,32,128], index: 5, kind: output, shape index: {}]  }
   0x1   :  { %12 = vsyncpa [#allocation3 + $0x1], 0  ;;  %s1197_s18 = smov 0   ;;  %s1199_s19 = smov 0  }
   0x2   :  { %s1201_s20 = smov 0   ;;  %s1203_s21 = smov 0  }
   0x3 LB: > { %s1218_s22 = sadd.s32 4294967295, %s1162_s21   ;;  %s885_s23 = sadd.s32 4294967294, %s1162_s21   ;;  %s1162_s21 = sphi %s1203_s21, %s1396_s21   ;;  %s1158_s20 = sphi %s1201_s20, %s1395_s20   ;;  %s1154_s19 = sphi %s1199_s19, %s1394_s19   ;;  %s1150_s18 = sphi %s1197_s18, %s1393_s18  }
   0x4   : > { %s1222_s24 = sadd.s32 1, %s1162_s21   ;;  %s135_s25 = sadd.s32 1, %s1158_s20 }
   0x5   : > { %s132_s26 = ssub.s32 %s1162_s21, %s1222_s24  ;;  %p145_p0 = scmp.ne.s32.totalorder %s1158_s20, %s1154_s19 }
   0x6   : > { %p133_p1 = scmp.eq.s32.totalorder %s132_s26, 0  ;;  %p146_p2 = scmp.eq.s32.totalorder %s1218_s22, 3 }
   0x7   : > { %p151_p3 = scmp.ne.s32.totalorder %s1154_s19, %s1150_s18  ;;  %p152_p4 = scmp.eq.s32.totalorder %s885_s23, 3 }
   0x8   : > { %s1233_s27 = scalar_select %p133_p1, %s1158_s20, %s135_s25  }
   0x9   : > { %p1235_p5 = por %p146_p2, %p145_p0  ;;  %p1239_p6 = por %p152_p4, %p151_p3 }
   0xa   : > { %p888_p7 = scmp.ge.s32.totalorder %s1162_s21, 1  ;;  %p190_p8 = scmp.lt.s32.totalorder %s1162_s21, 5 }
   0xc   : > { %p191_p9 = pnand %p888_p7, %p190_p8 }
   0xd   : > { %v1064_v0 = vld [vmem:[%s1386_s1 + $0x8] sm:$0xff] (!%p191_p9)   ;;  %p218_p10 = scmp.lt.s32.totalorder (!%p191_p9), %s1218_s22, 3  ;;  %v1067_v1 = vld [vmem:[%s1386_s1] sm:$0xff] (!%p191_p9)   ;;  %v1078_v17 = vld [vmem:[%s1388_s3 + $0x10] sm:$0xff] (!%p191_p9)   ;;  %vm247_vm0 = vsmask.f32 (!%p191_p9), 7424 }
   0xe   : > { %194 = sbr.rel (%p191_p9) target bundleno = 764 (0x2fc), region = 40  ;;  %959 = vmatprep.subr.bf16.mxu0 (!%p191_p9), %v1064_v0  ;;  %v1076_v2 = vld [vmem:[%s1388_s3] sm:$0xff] (!%p191_p9)   ;;  %v1077_v3 = vld [vmem:[%s1388_s3 + $0x8] sm:$0xff] (!%p191_p9)   ;;  %vm274_vm1 = vcmask (!%p191_p9), 130048   ;;  %v1079_v22 = vld [vmem:[%s1388_s3 + $0x18] sm:$0xff] (!%p191_p9)   ;;  %vm748_vm2 = vcmask (!%p191_p9), 1043456  }
   0xf   : > { %960 = vmatpush3.bf16.msra.mxu0 (!%p191_p9), %v1064_v0  ;;  %983 = vmatprep.subr.bf16.mxu1 (!%p191_p9), %v1076_v2  ;;  %v1069_v24 = vld [vmem:[%s1386_s1 + $0x10] sm:$0xff] (!%p191_p9)   ;;  %v1080_v26 = vld [vmem:[%s1388_s3 + $0x20] sm:$0xff] (!%p191_p9)   ;;  %v1081_v27 = vld [vmem:[%s1388_s3 + $0x28] sm:$0xff] (!%p191_p9)   ;;  %vm741_vm11 = vcmask (!%p191_p9), 64512   ;;  %s215_s6 = sand.u32 (!%p191_p9), 1, %s1154_s19   ;;  %s1164_s16 = smov (!%p191_p9), [#allocation2]  }
  0x10   : > { %965 = vmatprep.subr.bf16.mxu0 (!%p191_p9), %v1067_v1  ;;  %984 = vmatpush3.bf16.msra.mxu1 (!%p191_p9), %v1076_v2  ;;  %v1071_v30 = vld [vmem:[%s1386_s1 + $0x18] sm:$0xff] (!%p191_p9)   ;;  %v1082_v47 = vld [vmem:[%s1388_s3 + $0x30] sm:$0xff] (!%p191_p9)   ;;  %v917_v49 = vld [vmem:[%s1387_s2] ss:$0 sm:$0xff] (!%p191_p9)  ;;  %s889_s7 = sshll.u32 (!%p191_p9), %s215_s6, 5 }
  0x11   : > { %985 = vmatprep.subr.bf16.mxu1 (!%p191_p9), %v1077_v3  ;;  %v1083_v48 = vld [vmem:[%s1388_s3 + $0x38] sm:$0xff] (!%p191_p9)   ;;  %v740_v0 = vld [vmem:[%s1389_s4] sm:$0xf] (!%p191_p9)  ;;  %s217_s8 = scalar_lea.vmem (!%p191_p9), [#allocation2], %s889_s7 }
  0x14   : > { %986 = vmatpush3.bf16.msra.mxu1 (!%p191_p9), %v1077_v3 }
  0x15   : > { %s219_s9 = scalar_select %p218_p10, %s1218_s22, 3  ;;  %987 = vmatprep.subr.bf16.mxu1 %v1078_v17 }
  0x17   : > { %s1022_s10 = smul.u32 24, %s219_s9  ;;  %s823_s9 = sshll.u32 %s217_s8, 4  ;;  %s1335_s9 = int_to_ptr.vmem [resolvable:$true] %s823_s9 }
  0x18   : > { %988 = vmatpush3.bf16.msra.mxu1 %v1078_v17  ;;  %s1100_s14 = scalar_lea.vmem %s1335_s9, 512 }
  0x19   : > { %s1259_s15 = scalar_lea.vmem %s1385_s0, %s1022_s10  ;;  %989 = vmatprep.subr.bf16.mxu1 %v1079_v22  ;;  %s933_s10 = sshll.u32 %s1218_s22, 9 }
  0x1a   : > { %v224_v4 = vld [vmem:[%s1259_s15] sm:$0xf]  ;;  %v225_v5 = vld [vmem:[%s1259_s15 + $0x4] sm:$0xf]  ;;  %v226_v6 = vld [vmem:[%s1259_s15 + $0x8] sm:$0xf]  ;;  %s1342_s13 = scalar_lea.hbm %s1390_s5, %s933_s10  ;;  %p1101_p11 = scmp.ne.s32.totalorder %s1335_s9, %s1100_s14 }
  0x1b   : > { %v227_v7 = vld [vmem:[%s1259_s15 + $0xc] sm:$0xf]  ;;  %v893_v8 = vcombine.low %v224_v4, %v225_v5  ;;  %v1068_v10 = vld [vmem:[%s1259_s15 + $0x10] ss:$0 sps:$4 sm:$0x11]   ;;  %v1073_v28 = vld [vmem:[%s1259_s15 + $0x4] sm:$0xff]   ;;  %v904_v29 = vcombine.low %v225_v5, %v226_v6 }
  0x1c   : > { %v894_v9 = vcombine.low %v226_v6, %v227_v7  ;;  %v264_v15 = vshll.u32 %v1068_v10, 16  ;;  %990 = vmatpush3.bf16.msra.mxu1 %v1079_v22  ;;  %v1074_v31 = vld [vmem:[%s1259_s15 + $0xc] sm:$0xff]   ;;  %v486_v32 = vshll.u32 %v1073_v28, 16  ;;  %v484_v33 = vshrl.u32 %v1073_v28, 16  ;;  %s1344_s22 = scalar_lea.sflag [#allocation3], %s215_s6  ;;  %p1102_p12 = pnand %p1101_p11, %p1235_p5 }
  0x1d   : > { %v249_v11 = vshrl.u32 %v893_v8, 16  ;;  %v251_v12 = vshll.u32 %v893_v8, 16  ;;  %991 = vmatprep.subr.bf16.mxu1 %v1080_v26  ;;  %v491_v35 = vshll.u32 %v1074_v31, 16  ;;  %v389_v36 = vld [vmem:[%s1259_s15 + $0x10] sm:$0xf]  ;;  %v495_v42 = vshrl.u32 %v1074_v31, 16 }
  0x1e   : > { %v256_v13 = vshll.u32 %v894_v9, 16  ;;  %v260_v14 = vshrl.u32 %v894_v9, 16  ;;  %v266_v19 = vrot.slane %v264_v15, 1  ;;  %v488_v34 = vrot.slane %v486_v32, 1  ;;  %p1103_p13 = pneg %p1102_p12 }
  0x1f   : > { %v253_v16 = vrot.slane %v251_v12, 1  ;;  %v493_v38 = vrot.slane %v491_v35, 1  ;;  %v905_v39 = vcombine.low %v227_v7, %v389_v36  ;;  %v1075_v40 = vld [vmem:[%s1259_s15 + $0x14] ss:$0 sps:$4 sm:$0x11]   ;;  %s1104_s15 = sshll.u32 %s1164_s16, 4  ;;  %s1105_s15 = int_to_ptr.vmem [resolvable:$false] %s1104_s15 }
  0x20   : > { %v258_v18 = vrot.slane %v256_v13, 1  ;;  %992 = vmatpush3.bf16.msra.mxu1 %v1080_v26  ;;  %v489_v37 = vor.u32 %v488_v34, %v484_v33  ;;  %v499_v43 = vshll.u32 %v1075_v40, 16  ;;  %s1106_s17 = scalar_lea.vmem %s1105_s15, 1024  ;;  %p1107_p0 = scmp.lt.s32.totalorder %s1335_s9, %s1105_s15 }
  0x21   : > { %v254_v20 = vor.u32 %v253_v16, %v249_v11  ;;  %993 = vmatprep.subr.bf16.mxu1 %v1081_v27  ;;  %v497_v44 = vor.u32 %v495_v42, %v493_v38  ;;  %p1108_p1 = scmp.lt.s32.totalorder %s1106_s17, %s1100_s14 }
  0x22   : > { %v262_v21 = vor.u32 %v260_v14, %v258_v18  ;;  %v494_v41 = vsel %vm247_vm0, %v489_v37, %v493_v38  ;;  %v501_v45 = vrot.slane %v499_v43, 1 }
  0x23   : > { %v259_v23 = vsel %vm247_vm0, %v254_v20, %v258_v18  ;;  %p1109_p2 = por %p1108_p1, %p1107_p0 }
  0x24   : > { %961 = vmatprep.mubr.msk.bf16.mxu0 %vm274_vm1, %v259_v23  ;;  %v267_v25 = vsel %vm247_vm0, %v262_v21, %v266_v19  ;;  %994 = vmatpush3.bf16.msra.mxu1 %v1081_v27  ;;  %v502_v46 = vsel %vm247_vm0, %v497_v44, %v501_v45 }
  0x25   : > { %962 = vmatmul.mubr.msk.bf16.vlgmr.msra.gmra.mrb[0].mxu0 %vm274_vm1, %v267_v25  ;;  %995 = vmatprep.subr.bf16.mxu1 %v1082_v47  ;;  %p1110_p3 = pnand %p1109_p2, %p1103_p13 }
  0x26   : > { %966 = vmatpush3.bf16.msra.mxu0 %v1067_v1  ;;  %967 = vmatprep.mubr.msk.bf16.mxu0 %vm274_vm1, %v893_v8  ;;  %v750_v1 = vsel %vm748_vm2, %v740_v0, 0 }
  0x27   : > { %971 = vmatprep.subr.bf16.mxu0 %v1069_v24 }
  0x28   : > { %996 = vmatpush3.bf16.msra.mxu1 %v1082_v47 }
  0x29   : > { %997 = vmatprep.subr.bf16.mxu1 %v1083_v48 }
  0x2c   : > { %998 = vmatpush3.bf16.msra.mxu1 %v1083_v48 }
  0x31   : > { %968 = vmatmul.mubr.msk.bf16.vlgmr.msra.gmra.mrb[0].mxu0 %vm274_vm1, %v894_v9 }
  0x32   : > { %972 = vmatpush3.bf16.msra.mxu0 %v1069_v24  ;;  %973 = vmatprep.mubr.msk.bf16.mxu0 %vm274_vm1, %v904_v29 }
  0x33   : > { %977 = vmatprep.subr.bf16.mxu0 %v1071_v30 }
  0x3d   : > { %974 = vmatmul.mubr.msk.bf16.vlgmr.msra.gmra.mrb[0].mxu0 %vm274_vm1, %v905_v39 }
  0x3e   : > { %978 = vmatpush3.bf16.msra.mxu0 %v1071_v30  ;;  %979 = vmatprep.mubr.msk.bf16.mxu0 %vm274_vm1, %v494_v41 }
  0x3f   : > { %1021 = vmatprep.subr.msk.bf16.mxu0 %vm748_vm2, %v740_v0 }
  0x49   : > { %980 = vmatmul.mubr.msk.bf16.vlgmr.msra.gmra.mrb[0].mxu0 %vm274_vm1, %v502_v46 }
  0x4a   : > { %1004 = vmatpush3.bf16.msra.mxu0 %v750_v1 }
 0x11c   : > { %v981_v50 = vpop.f32.mrb[0].mxu0 }
 0x11d   : > { %v549_v51 = vpop.f32.mrb[1].mxu0  ;;  %v1314_v54 = vadd.f32 %v981_v50, %v917_v49 }
 0x11e   : > { %v1312_v52 = vadd.f32 %v917_v49, %v549_v51  ;;  %v982_v53 = vpop.f32.mrb[2].mxu0 }
 0x11f   : > { %v1316_v55 = vadd.f32 %v982_v53, %v917_v49  ;;  %v552_v56 = vpop.f32.mrb[3].mxu0  ;;  %v581_v61 = vmul.f32 %v1314_v54, %v1314_v54 }
 0x120   : > { %v1318_v57 = vadd.f32 %v917_v49, %v552_v56  ;;  %v579_v59 = vmul.f32 %v1312_v52, %v1312_v52 }
 0x121   : > { %v582_v58 = vmul.f32 %v1316_v55, %v1316_v55 }
 0x122   : > { %v580_v60 = vmul.f32 %v1318_v57, %v1318_v57 }
 0x123   : > { %v584_v63 = vpack.c.bf16 %v582_v58, %v581_v61 }
 0x124   : > { %v583_v62 = vpack.c.bf16 %v580_v60, %v579_v59 }
 0x126   : > { %999 = vmatprep.mubr.bf16.mxu1 %v583_v62 }
 0x127   : > { %1000 = vmatmul.mubr.bf16.vlgmr.msra.gmra.mrb[0].mxu1 %v584_v63 }
 0x1fa   : > { %v1001_v2 = vpop.f32.mrb[0].mxu1 }
 0x1fb   : > { %1084 = vrsqrt.f32 %v1001_v2  ;;  %v683_v3 = vpop.f32.mrb[1].mxu1  ;;  %v728_v4 = vadd.f32 1.0, %v1001_v2  ;;  %vm714_vm3 = vcmp.eq.f32.partialorder %v1001_v2, inf  ;;  %v717_v14 = vand.u32 2147483648, %v1001_v2 }
 0x1fc   : > { %1086 = vrsqrt.f32 %v683_v3  ;;  %v1002_v5 = vpop.f32.mrb[2].mxu1  ;;  %v726_v8 = vadd.f32 1.0, %v683_v3  ;;  %vm716_vm4 = vcmp.eq.f32.partialorder %v1001_v2, 0.0  ;;  %vm700_vm6 = vcmp.eq.f32.partialorder %v683_v3, inf }
 0x1fd   : > { %1088 = vrsqrt.f32 %v1002_v5  ;;  %v686_v6 = vpop.f32.mrb[3].mxu1  ;;  %v729_v7 = vadd.f32 1.0, %v1002_v5  ;;  %vm721_vm5 = vcmp.eq.f32.partialorder %v1002_v5, inf  ;;  %v724_v19 = vand.u32 2147483648, %v1002_v5 }
 0x1fe   : > { %1090 = vrcp.f32 %v728_v4  ;;  %v727_v9 = vadd.f32 1.0, %v686_v6  ;;  %vm723_vm7 = vcmp.eq.f32.partialorder %v1002_v5, 0.0  ;;  %v703_v25 = vand.u32 2147483648, %v683_v3 }
 0x1ff   : > { %1092 = vrcp.f32 %v729_v7  ;;  %vm702_vm8 = vcmp.eq.f32.partialorder %v683_v3, 0.0  ;;  %vm707_vm9 = vcmp.eq.f32.partialorder %v686_v6, inf  ;;  %v710_v30 = vand.u32 2147483648, %v686_v6 }
 0x200   : > { %1094 = vrsqrt.f32 %v686_v6  ;;  %vm709_vm10 = vcmp.eq.f32.partialorder %v686_v6, 0.0 }
 0x201   : > { %1096 = vrcp.f32 %v726_v8 }
 0x202   : > { %1098 = vrcp.f32 %v727_v9 }
 0x205   : > { %v1085_v10 = vpop.eup %1084 }
 0x206   : > { %v1087_v11 = vpop.eup %1086  ;;  %v713_v12 = vmul.f32 %v1085_v10, %v1001_v2 }
 0x207   : > { %v1089_v13 = vpop.eup %1088  ;;  %v699_v15 = vmul.f32 %v1087_v11, %v683_v3 }
 0x208   : > { %v715_v16 = vsel %vm714_vm3, %v1001_v2, %v713_v12  ;;  %v720_v17 = vmul.f32 %v1089_v13, %v1002_v5  ;;  %v1091_v18 = vpop.eup %1090 }
 0x209   : > { %v718_v20 = vsel %vm716_vm4, %v717_v14, %v715_v16  ;;  %v1093_v21 = vpop.eup %1092  ;;  %v701_v23 = vsel %vm700_vm6, %v683_v3, %v699_v15 }
 0x20a   : > { %v722_v22 = vsel %vm721_vm5, %v1002_v5, %v720_v17  ;;  %v1095_v24 = vpop.eup %1094  ;;  %v736_v28 = vmul.f32 %v1091_v18, %v718_v20  ;;  %v704_v31 = vsel %vm702_vm8, %v703_v25, %v701_v23 }
 0x20b   : > { %v725_v26 = vsel %vm723_vm7, %v724_v19, %v722_v22  ;;  %v706_v27 = vmul.f32 %v1095_v24, %v686_v6  ;;  %v1097_v32 = vpop.eup %1096 }
 0x20c   : > { %v737_v29 = vmul.f32 %v1093_v21, %v725_v26  ;;  %v1099_v35 = vpop.eup %1098  ;;  %v734_v37 = vmul.f32 %v1097_v32, %v704_v31 }
 0x20d   : > { %v708_v33 = vsel %vm707_vm9, %v686_v6, %v706_v27 }
 0x20e   : > { %v739_v34 = vpack.c.bf16 %v737_v29, %v736_v28  ;;  %v711_v36 = vsel %vm709_vm10, %v710_v30, %v708_v33 }
 0x20f   : > { %v735_v38 = vmul.f32 %v1099_v35, %v711_v36 }
 0x211   : > { %v738_v39 = vpack.c.bf16 %v735_v38, %v734_v37 }
 0x213   : > { %1005 = vmatprep.mubr.msk.bf16.mxu0 %vm741_vm11, %v738_v39 }
 0x214   : > { %1006 = vmatmul.mubr.msk.bf16.vlgmr.msra.gmra.mrb[4].mxu0 %vm741_vm11, %v739_v34 }
 0x2e7   : > { %v1007_v40 = vpop.f32.mrb[4].mxu0 }
 0x2e8   : > { %v803_v41 = vmul.f32 %v1007_v40, %v1314_v54  ;;  %v786_v42 = vpop.f32.mrb[5].mxu0 }
 0x2e9   : > { %v801_v43 = vmul.f32 %v786_v42, %v1312_v52  ;;  %v1008_v44 = vpop.f32.mrb[6].mxu0 }
 0x2ea   : > { %807 = vst [vmem:[%s217_s8 + $0x10] sm:$0xff] %v803_v41  ;;  %v804_v45 = vmul.f32 %v1008_v44, %v1316_v55  ;;  %v789_v46 = vpop.f32.mrb[7].mxu0 }
 0x2eb   : > { %805 = vst [vmem:[%s217_s8] sm:$0xff] %v801_v43  ;;  %v802_v47 = vmul.f32 %v789_v46, %v1318_v57 }
 0x2ec   : > { %808 = vst [vmem:[%s217_s8 + $0x18] sm:$0xff] %v804_v45 }
 0x2ed   : > { %806 = vst [vmem:[%s217_s8 + $0x8] sm:$0xff] %v802_v47 }
 0x2ee   : > { %1113 = shalt.err (!%p1110_p3)
}
 0x2ef   : > { %s1114_s23 = scalar_lea.hbm %s1342_s13, 512  ;;  %s1118_s30 = scalar_lea.hbm %s1390_s5, 2048 }
 0x2f0   : > { %p1115_p4 = scmp.ne.s32.totalorder %s1342_s13, %s1114_s23  ;;  %p1119_p9 = scmp.lt.u32.totalorder %s1342_s13, %s1390_s5 }
 0x2f1   : > { %p1120_p10 = scmp.lt.u32.totalorder %s1118_s30, %s1114_s23  ;;  %p1122_p12 = scmp.lt.u32.totalorder %s1114_s23, %s1342_s13 }
 0x2f2   : > { %p1116_p7 = pnand %p1115_p4, %p1235_p5 }
 0x2f3   : > { %p1121_p11 = por %p1120_p10, %p1119_p9 }
 0x2f4   : > { %p1117_p8 = pneg %p1116_p7 }
 0x2f5   : > { %p1123_p13 = por %p1122_p12, %p1121_p11 }
 0x2f7   : > { %p1124_p0 = pnand %p1123_p13, %p1117_p8 }
 0x2f9   : > { %1127 = shalt.err (!%p1124_p0)
}
 0x2fa   : > { %s1165_s8 = smov 128   ;;  %s1166_s10 = smov 8  }
 0x2fb   : > { %1023 = dma.vmem_to_hbm [thread:$0]  (%p1235_p5), %s1335_s9, 512, %s1342_s13, %s1344_s22, %s1165_s8, %s1165_s8, %s1166_s10  }
 0x2fc PF: > { %p1029_p1 = scmp.ge.s32.totalorder %s1162_s21, 2  ;;  %s838_s11 = sand.u32 1, %s1150_s18  }
 0x2fd   : > { %s839_s12 = scalar_lea.sflag [#allocation3], %s838_s11 }
 0x2fe   : > { %p1026_p2 = pnand %p1029_p1, %p1239_p6 }
 0x300   : > { %1145 = dma.done.wait (!%p1026_p2), %s839_s12, 512  }
 0x301   : > { %1147 = vsyncadd (!%p1026_p2), %s839_s12, 4294966784  ;;  %p15_p3 = scmp.ge.s32.totalorder %s1222_s24, 6   ;;  %s1393_s18 = smov %s1154_s19 }
 0x302   : > { %s1394_s19 = smov %s1158_s20  ;;  %s1395_s20 = smov %s1233_s27 }
 0x303   : > { %s1396_s21 = smov %s1222_s24  ;;  %17 = sbr.rel (!%p15_p3) target bundleno = 3 (0x3), region = 78 }
 0x30a   :  { %844 = vsyncpa [#allocation3], 1 }
 0x30b   :  { %846 = vsyncpa [#allocation3 + $0x1], 1 }

// kernel: tpu_custom_call.1
= control target key start
LH: loop header
LB: loop body
LE: loop exit
PB: predicated region body
PF: predicated region fallthrough
CT: control target
= control target key end

     0   :  { %10 = vsyncpa [#allocation3], 0  ;;  %s1385_s0 = inlined_call_operand.vmem [shape: bf16[4,48,16], index: 0, kind: input, shape index: {}]   ;;  %s1386_s1 = inlined_call_operand.vmem [shape: bf16[4,16,128], index: 1, kind: input, shape index: {}]   ;;  %s1387_s2 = inlined_call_operand.vmem [shape: f32[1,128], index: 2, kind: input, shape index: {}]   ;;  %s1388_s3 = inlined_call_operand.vmem [shape: bf16[128,8], index: 3, kind: input, shape index: {}]   ;;  %s1389_s4 = inlined_call_operand.vmem [shape: bf16[8,128], index: 4, kind: input, shape index: {}]   ;;  %s1390_s5 = inlined_call_operand.hbm [shape: f32[4,32,128], index: 5, kind: output, shape index: {}]  }
   0x1   :  { %12 = vsyncpa [#allocation3 + $0x1], 0  ;;  %s1197_s18 = smov 0   ;;  %s1199_s19 = smov 0  }
   0x2   :  { %s1201_s20 = smov 0   ;;  %s1203_s21 = smov 0  }
   0x3 LB: > { %s1218_s22 = sadd.s32 4294967295, %s1162_s21   ;;  %s885_s23 = sadd.s32 4294967294, %s1162_s21   ;;  %s1162_s21 = sphi %s1203_s21, %s1396_s21   ;;  %s1158_s20 = sphi %s1201_s20, %s1395_s20   ;;  %s1154_s19 = sphi %s1199_s19, %s1394_s19   ;;  %s1150_s18 = sphi %s1197_s18, %s1393_s18  }
   0x4   : > { %s1222_s24 = sadd.s32 1, %s1162_s21   ;;  %s135_s25 = sadd.s32 1, %s1158_s20 }
   0x5   : > { %s132_s26 = ssub.s32 %s1162_s21, %s1222_s24  ;;  %p145_p0 = scmp.ne.s32.totalorder %s1158_s20, %s1154_s19 }
   0x6   : > { %p133_p1 = scmp.eq.s32.totalorder %s132_s26, 0  ;;  %p146_p2 = scmp.eq.s32.totalorder %s1218_s22, 3 }
   0x7   : > { %p151_p3 = scmp.ne.s32.totalorder %s1154_s19, %s1150_s18  ;;  %p152_p4 = scmp.eq.s32.totalorder %s885_s23, 3 }
   0x8   : > { %s1233_s27 = scalar_select %p133_p1, %s1158_s20, %s135_s25  }
   0x9   : > { %p1235_p5 = por %p146_p2, %p145_p0  ;;  %p1239_p6 = por %p152_p4, %p151_p3 }
   0xa   : > { %p888_p7 = scmp.ge.s32.totalorder %s1162_s21, 1  ;;  %p190_p8 = scmp.lt.s32.totalorder %s1162_s21, 5 }
   0xc   : > { %p191_p9 = pnand %p888_p7, %p190_p8 }
   0xd   : > { %v1064_v0 = vld [vmem:[%s1386_s1 + $0x8] sm:$0xff] (!%p191_p9)   ;;  %p218_p10 = scmp.lt.s32.totalorder (!%p191_p9), %s1218_s22, 3  ;;  %v1067_v1 = vld [vmem:[%s1386_s1] sm:$0xff] (!%p191_p9)   ;;  %v1078_v17 = vld [vmem:[%s1388_s3 + $0x10] sm:$0xff] (!%p191_p9)   ;;  %vm247_vm0 = vsmask.f32 (!%p191_p9), 7424 }
   0xe   : > { %194 = sbr.rel (%p191_p9) target bundleno = 764 (0x2fc), region = 40  ;;  %959 = vmatprep.subr.bf16.mxu0 (!%p191_p9), %v1064_v0  ;;  %v1076_v2 = vld [vmem:[%s1388_s3] sm:$0xff] (!%p191_p9)   ;;  %v1077_v3 = vld [vmem:[%s1388_s3 + $0x8] sm:$0xff] (!%p191_p9)   ;;  %vm274_vm1 = vcmask (!%p191_p9), 130048   ;;  %v1079_v22 = vld [vmem:[%s1388_s3 + $0x18] sm:$0xff] (!%p191_p9)   ;;  %vm748_vm2 = vcmask (!%p191_p9), 1043456  }
   0xf   : > { %960 = vmatpush3.bf16.msra.mxu0 (!%p191_p9), %v1064_v0  ;;  %983 = vmatprep.subr.bf16.mxu1 (!%p191_p9), %v1076_v2  ;;  %v1069_v24 = vld [vmem:[%s1386_s1 + $0x10] sm:$0xff] (!%p191_p9)   ;;  %v1080_v26 = vld [vmem:[%s1388_s3 + $0x20] sm:$0xff] (!%p191_p9)   ;;  %v1081_v27 = vld [vmem:[%s1388_s3 + $0x28] sm:$0xff] (!%p191_p9)   ;;  %vm741_vm11 = vcmask (!%p191_p9), 64512   ;;  %s215_s6 = sand.u32 (!%p191_p9), 1, %s1154_s19   ;;  %s1164_s16 = smov (!%p191_p9), [#allocation2]  }
  0x10   : > { %965 = vmatprep.subr.bf16.mxu0 (!%p191_p9), %v1067_v1  ;;  %984 = vmatpush3.bf16.msra.mxu1 (!%p191_p9), %v1076_v2  ;;  %v1071_v30 = vld [vmem:[%s1386_s1 + $0x18] sm:$0xff] (!%p191_p9)   ;;  %v1082_v47 = vld [vmem:[%s1388_s3 + $0x30] sm:$0xff] (!%p191_p9)   ;;  %v917_v49 = vld [vmem:[%s1387_s2] ss:$0 sm:$0xff] (!%p191_p9)  ;;  %s889_s7 = sshll.u32 (!%p191_p9), %s215_s6, 5 }
  0x11   : > { %985 = vmatprep.subr.bf16.mxu1 (!%p191_p9), %v1077_v3  ;;  %v1083_v48 = vld [vmem:[%s1388_s3 + $0x38] sm:$0xff] (!%p191_p9)   ;;  %v740_v0 = vld [vmem:[%s1389_s4] sm:$0xf] (!%p191_p9)  ;;  %s217_s8 = scalar_lea.vmem (!%p191_p9), [#allocation2], %s889_s7 }
  0x14   : > { %986 = vmatpush3.bf16.msra.mxu1 (!%p191_p9), %v1077_v3 }
  0x15   : > { %s219_s9 = scalar_select %p218_p10, %s1218_s22, 3  ;;  %987 = vmatprep.subr.bf16.mxu1 %v1078_v17 }
  0x17   : > { %s1022_s10 = smul.u32 24, %s219_s9  ;;  %s823_s9 = sshll.u32 %s217_s8, 4  ;;  %s1335_s9 = int_to_ptr.vmem [resolvable:$true] %s823_s9 }
  0x18   : > { %988 = vmatpush3.bf16.msra.mxu1 %v1078_v17  ;;  %s1100_s14 = scalar_lea.vmem %s1335_s9, 512 }
  0x19   : > { %s1259_s15 = scalar_lea.vmem %s1385_s0, %s1022_s10  ;;  %989 = vmatprep.subr.bf16.mxu1 %v1079_v22  ;;  %s933_s10 = sshll.u32 %s1218_s22, 9 }
  0x1a   : > { %v224_v4 = vld [vmem:[%s1259_s15] sm:$0xf]  ;;  %v225_v5 = vld [vmem:[%s1259_s15 + $0x4] sm:$0xf]  ;;  %v226_v6 = vld [vmem:[%s1259_s15 + $0x8] sm:$0xf]  ;;  %s1342_s13 = scalar_lea.hbm %s1390_s5, %s933_s10  ;;  %p1101_p11 = scmp.ne.s32.totalorder %s1335_s9, %s1100_s14 }
  0x1b   : > { %v227_v7 = vld [vmem:[%s1259_s15 + $0xc] sm:$0xf]  ;;  %v893_v8 = vcombine.low %v224_v4, %v225_v5  ;;  %v1068_v10 = vld [vmem:[%s1259_s15 + $0x10] ss:$0 sps:$4 sm:$0x11]   ;;  %v1073_v28 = vld [vmem:[%s1259_s15 + $0x4] sm:$0xff]   ;;  %v904_v29 = vcombine.low %v225_v5, %v226_v6 }
  0x1c   : > { %v894_v9 = vcombine.low %v226_v6, %v227_v7  ;;  %v264_v15 = vshll.u32 %v1068_v10, 16  ;;  %990 = vmatpush3.bf16.msra.mxu1 %v1079_v22  ;;  %v1074_v31 = vld [vmem:[%s1259_s15 + $0xc] sm:$0xff]   ;;  %v486_v32 = vshll.u32 %v1073_v28, 16  ;;  %v484_v33 = vshrl.u32 %v1073_v28, 16  ;;  %s1344_s22 = scalar_lea.sflag [#allocation3], %s215_s6  ;;  %p1102_p12 = pnand %p1101_p11, %p1235_p5 }
  0x1d   : > { %v249_v11 = vshrl.u32 %v893_v8, 16  ;;  %v251_v12 = vshll.u32 %v893_v8, 16  ;;  %991 = vmatprep.subr.bf16.mxu1 %v1080_v26  ;;  %v491_v35 = vshll.u32 %v1074_v31, 16  ;;  %v389_v36 = vld [vmem:[%s1259_s15 + $0x10] sm:$0xf]  ;;  %v495_v42 = vshrl.u32 %v1074_v31, 16 }
  0x1e   : > { %v256_v13 = vshll.u32 %v894_v9, 16  ;;  %v260_v14 = vshrl.u32 %v894_v9, 16  ;;  %v266_v19 = vrot.slane %v264_v15, 1  ;;  %v488_v34 = vrot.slane %v486_v32, 1  ;;  %p1103_p13 = pneg %p1102_p12 }
  0x1f   : > { %v253_v16 = vrot.slane %v251_v12, 1  ;;  %v493_v38 = vrot.slane %v491_v35, 1  ;;  %v905_v39 = vcombine.low %v227_v7, %v389_v36  ;;  %v1075_v40 = vld [vmem:[%s1259_s15 + $0x14] ss:$0 sps:$4 sm:$0x11]   ;;  %s1104_s15 = sshll.u32 %s1164_s16, 4  ;;  %s1105_s15 = int_to_ptr.vmem [resolvable:$false] %s1104_s15 }
  0x20   : > { %v258_v18 = vrot.slane %v256_v13, 1  ;;  %992 = vmatpush3.bf16.msra.mxu1 %v1080_v26  ;;  %v489_v37 = vor.u32 %v488_v34, %v484_v33  ;;  %v499_v43 = vshll.u32 %v1075_v40, 16  ;;  %s1106_s17 = scalar_lea.vmem %s1105_s15, 1024  ;;  %p1107_p0 = scmp.lt.s32.totalorder %s1335_s9, %s1105_s15 }
  0x21   : > { %v254_v20 = vor.u32 %v253_v16, %v249_v11  ;;  %993 = vmatprep.subr.bf16.mxu1 %v1081_v27  ;;  %v497_v44 = vor.u32 %v495_v42, %v493_v38  ;;  %p1108_p1 = scmp.lt.s32.totalorder %s1106_s17, %s1100_s14 }
  0x22   : > { %v262_v21 = vor.u32 %v260_v14, %v258_v18  ;;  %v494_v41 = vsel %vm247_vm0, %v489_v37, %v493_v38  ;;  %v501_v45 = vrot.slane %v499_v43, 1 }
  0x23   : > { %v259_v23 = vsel %vm247_vm0, %v254_v20, %v258_v18  ;;  %p1109_p2 = por %p1108_p1, %p1107_p0 }
  0x24   : > { %961 = vmatprep.mubr.msk.bf16.mxu0 %vm274_vm1, %v259_v23  ;;  %v267_v25 = vsel %vm247_vm0, %v262_v21, %v266_v19  ;;  %994 = vmatpush3.bf16.msra.mxu1 %v1081_v27  ;;  %v502_v46 = vsel %vm247_vm0, %v497_v44, %v501_v45 }
  0x25   : > { %962 = vmatmul.mubr.msk.bf16.vlgmr.msra.gmra.mrb[0].mxu0 %vm274_vm1, %v267_v25  ;;  %995 = vmatprep.subr.bf16.mxu1 %v1082_v47  ;;  %p1110_p3 = pnand %p1109_p2, %p1103_p13 }
  0x26   : > { %966 = vmatpush3.bf16.msra.mxu0 %v1067_v1  ;;  %967 = vmatprep.mubr.msk.bf16.mxu0 %vm274_vm1, %v893_v8  ;;  %v750_v1 = vsel %vm748_vm2, %v740_v0, 0 }
  0x27   : > { %971 = vmatprep.subr.bf16.mxu0 %v1069_v24 }
  0x28   : > { %996 = vmatpush3.bf16.msra.mxu1 %v1082_v47 }
  0x29   : > { %997 = vmatprep.subr.bf16.mxu1 %v1083_v48 }
  0x2c   : > { %998 = vmatpush3.bf16.msra.mxu1 %v1083_v48 }
  0x31   : > { %968 = vmatmul.mubr.msk.bf16.vlgmr.msra.gmra.mrb[0].mxu0 %vm274_vm1, %v894_v9 }
  0x32   : > { %972 = vmatpush3.bf16.msra.mxu0 %v1069_v24  ;;  %973 = vmatprep.mubr.msk.bf16.mxu0 %vm274_vm1, %v904_v29 }
  0x33   : > { %977 = vmatprep.subr.bf16.mxu0 %v1071_v30 }
  0x3d   : > { %974 = vmatmul.mubr.msk.bf16.vlgmr.msra.gmra.mrb[0].mxu0 %vm274_vm1, %v905_v39 }
  0x3e   : > { %978 = vmatpush3.bf16.msra.mxu0 %v1071_v30  ;;  %979 = vmatprep.mubr.msk.bf16.mxu0 %vm274_vm1, %v494_v41 }
  0x3f   : > { %1021 = vmatprep.subr.msk.bf16.mxu0 %vm748_vm2, %v740_v0 }
  0x49   : > { %980 = vmatmul.mubr.msk.bf16.vlgmr.msra.gmra.mrb[0].mxu0 %vm274_vm1, %v502_v46 }
  0x4a   : > { %1004 = vmatpush3.bf16.msra.mxu0 %v750_v1 }
 0x11c   : > { %v981_v50 = vpop.f32.mrb[0].mxu0 }
 0x11d   : > { %v549_v51 = vpop.f32.mrb[1].mxu0  ;;  %v1314_v54 = vadd.f32 %v981_v50, %v917_v49 }
 0x11e   : > { %v1312_v52 = vadd.f32 %v917_v49, %v549_v51  ;;  %v982_v53 = vpop.f32.mrb[2].mxu0 }
 0x11f   : > { %v1316_v55 = vadd.f32 %v982_v53, %v917_v49  ;;  %v552_v56 = vpop.f32.mrb[3].mxu0  ;;  %v581_v61 = vmul.f32 %v1314_v54, %v1314_v54 }
 0x120   : > { %v1318_v57 = vadd.f32 %v917_v49, %v552_v56  ;;  %v579_v59 = vmul.f32 %v1312_v52, %v1312_v52 }
 0x121   : > { %v582_v58 = vmul.f32 %v1316_v55, %v1316_v55 }
 0x122   : > { %v580_v60 = vmul.f32 %v1318_v57, %v1318_v57 }
 0x123   : > { %v584_v63 = vpack.c.bf16 %v582_v58, %v581_v61 }
 0x124   : > { %v583_v62 = vpack.c.bf16 %v580_v60, %v579_v59 }
 0x126   : > { %999 = vmatprep.mubr.bf16.mxu1 %v583_v62 }
 0x127   : > { %1000 = vmatmul.mubr.bf16.vlgmr.msra.gmra.mrb[0].mxu1 %v584_v63 }
 0x1fa   : > { %v1001_v2 = vpop.f32.mrb[0].mxu1 }
 0x1fb   : > { %1084 = vrsqrt.f32 %v1001_v2  ;;  %v683_v3 = vpop.f32.mrb[1].mxu1  ;;  %v728_v4 = vadd.f32 1.0, %v1001_v2  ;;  %vm714_vm3 = vcmp.eq.f32.partialorder %v1001_v2, inf  ;;  %v717_v14 = vand.u32 2147483648, %v1001_v2 }
 0x1fc   : > { %1086 = vrsqrt.f32 %v683_v3  ;;  %v1002_v5 = vpop.f32.mrb[2].mxu1  ;;  %v726_v8 = vadd.f32 1.0, %v683_v3  ;;  %vm716_vm4 = vcmp.eq.f32.partialorder %v1001_v2, 0.0  ;;  %vm700_vm6 = vcmp.eq.f32.partialorder %v683_v3, inf }
 0x1fd   : > { %1088 = vrsqrt.f32 %v1002_v5  ;;  %v686_v6 = vpop.f32.mrb[3].mxu1  ;;  %v729_v7 = vadd.f32 1.0, %v1002_v5  ;;  %vm721_vm5 = vcmp.eq.f32.partialorder %v1002_v5, inf  ;;  %v724_v19 = vand.u32 2147483648, %v1002_v5 }
 0x1fe   : > { %1090 = vrcp.f32 %v728_v4  ;;  %v727_v9 = vadd.f32 1.0, %v686_v6  ;;  %vm723_vm7 = vcmp.eq.f32.partialorder %v1002_v5, 0.0  ;;  %v703_v25 = vand.u32 2147483648, %v683_v3 }
 0x1ff   : > { %1092 = vrcp.f32 %v729_v7  ;;  %vm702_vm8 = vcmp.eq.f32.partialorder %v683_v3, 0.0  ;;  %vm707_vm9 = vcmp.eq.f32.partialorder %v686_v6, inf  ;;  %v710_v30 = vand.u32 2147483648, %v686_v6 }
 0x200   : > { %1094 = vrsqrt.f32 %v686_v6  ;;  %vm709_vm10 = vcmp.eq.f32.partialorder %v686_v6, 0.0 }
 0x201   : > { %1096 = vrcp.f32 %v726_v8 }
 0x202   : > { %1098 = vrcp.f32 %v727_v9 }
 0x205   : > { %v1085_v10 = vpop.eup %1084 }
 0x206   : > { %v1087_v11 = vpop.eup %1086  ;;  %v713_v12 = vmul.f32 %v1085_v10, %v1001_v2 }
 0x207   : > { %v1089_v13 = vpop.eup %1088  ;;  %v699_v15 = vmul.f32 %v1087_v11, %v683_v3 }
 0x208   : > { %v715_v16 = vsel %vm714_vm3, %v1001_v2, %v713_v12  ;;  %v720_v17 = vmul.f32 %v1089_v13, %v1002_v5  ;;  %v1091_v18 = vpop.eup %1090 }
 0x209   : > { %v718_v20 = vsel %vm716_vm4, %v717_v14, %v715_v16  ;;  %v1093_v21 = vpop.eup %1092  ;;  %v701_v23 = vsel %vm700_vm6, %v683_v3, %v699_v15 }
 0x20a   : > { %v722_v22 = vsel %vm721_vm5, %v1002_v5, %v720_v17  ;;  %v1095_v24 = vpop.eup %1094  ;;  %v736_v28 = vmul.f32 %v1091_v18, %v718_v20  ;;  %v704_v31 = vsel %vm702_vm8, %v703_v25, %v701_v23 }
 0x20b   : > { %v725_v26 = vsel %vm723_vm7, %v724_v19, %v722_v22  ;;  %v706_v27 = vmul.f32 %v1095_v24, %v686_v6  ;;  %v1097_v32 = vpop.eup %1096 }
 0x20c   : > { %v737_v29 = vmul.f32 %v1093_v21, %v725_v26  ;;  %v1099_v35 = vpop.eup %1098  ;;  %v734_v37 = vmul.f32 %v1097_v32, %v704_v31 }
 0x20d   : > { %v708_v33 = vsel %vm707_vm9, %v686_v6, %v706_v27 }
 0x20e   : > { %v739_v34 = vpack.c.bf16 %v737_v29, %v736_v28  ;;  %v711_v36 = vsel %vm709_vm10, %v710_v30, %v708_v33 }
 0x20f   : > { %v735_v38 = vmul.f32 %v1099_v35, %v711_v36 }
 0x211   : > { %v738_v39 = vpack.c.bf16 %v735_v38, %v734_v37 }
 0x213   : > { %1005 = vmatprep.mubr.msk.bf16.mxu0 %vm741_vm11, %v738_v39 }
 0x214   : > { %1006 = vmatmul.mubr.msk.bf16.vlgmr.msra.gmra.mrb[4].mxu0 %vm741_vm11, %v739_v34 }
 0x2e7   : > { %v1007_v40 = vpop.f32.mrb[4].mxu0 }
 0x2e8   : > { %v803_v41 = vmul.f32 %v1007_v40, %v1314_v54  ;;  %v786_v42 = vpop.f32.mrb[5].mxu0 }
 0x2e9   : > { %v801_v43 = vmul.f32 %v786_v42, %v1312_v52  ;;  %v1008_v44 = vpop.f32.mrb[6].mxu0 }
 0x2ea   : > { %807 = vst [vmem:[%s217_s8 + $0x10] sm:$0xff] %v803_v41  ;;  %v804_v45 = vmul.f32 %v1008_v44, %v1316_v55  ;;  %v789_v46 = vpop.f32.mrb[7].mxu0 }
 0x2eb   : > { %805 = vst [vmem:[%s217_s8] sm:$0xff] %v801_v43  ;;  %v802_v47 = vmul.f32 %v789_v46, %v1318_v57 }
 0x2ec   : > { %808 = vst [vmem:[%s217_s8 + $0x18] sm:$0xff] %v804_v45 }
 0x2ed   : > { %806 = vst [vmem:[%s217_s8 + $0x8] sm:$0xff] %v802_v47 }
 0x2ee   : > { %1113 = shalt.err (!%p1110_p3)
}
 0x2ef   : > { %s1114_s23 = scalar_lea.hbm %s1342_s13, 512  ;;  %s1118_s30 = scalar_lea.hbm %s1390_s5, 2048 }
 0x2f0   : > { %p1115_p4 = scmp.ne.s32.totalorder %s1342_s13, %s1114_s23  ;;  %p1119_p9 = scmp.lt.u32.totalorder %s1342_s13, %s1390_s5 }
 0x2f1   : > { %p1120_p10 = scmp.lt.u32.totalorder %s1118_s30, %s1114_s23  ;;  %p1122_p12 = scmp.lt.u32.totalorder %s1114_s23, %s1342_s13 }
 0x2f2   : > { %p1116_p7 = pnand %p1115_p4, %p1235_p5 }
 0x2f3   : > { %p1121_p11 = por %p1120_p10, %p1119_p9 }
 0x2f4   : > { %p1117_p8 = pneg %p1116_p7 }
 0x2f5   : > { %p1123_p13 = por %p1122_p12, %p1121_p11 }
 0x2f7   : > { %p1124_p0 = pnand %p1123_p13, %p1117_p8 }
 0x2f9   : > { %1127 = shalt.err (!%p1124_p0)
}
 0x2fa   : > { %s1165_s8 = smov 128   ;;  %s1166_s10 = smov 8  }
 0x2fb   : > { %1023 = dma.vmem_to_hbm [thread:$0]  (%p1235_p5), %s1335_s9, 512, %s1342_s13, %s1344_s22, %s1165_s8, %s1165_s8, %s1166_s10  }
 0x2fc PF: > { %p1029_p1 = scmp.ge.s32.totalorder %s1162_s21, 2  ;;  %s838_s11 = sand.u32 1, %s1150_s18  }
 0x2fd   : > { %s839_s12 = scalar_lea.sflag [#allocation3], %s838_s11 }
 0x2fe   : > { %p1026_p2 = pnand %p1029_p1, %p1239_p6 }
 0x300   : > { %1145 = dma.done.wait (!%p1026_p2), %s839_s12, 512  }
 0x301   : > { %1147 = vsyncadd (!%p1026_p2), %s839_s12, 4294966784  ;;  %p15_p3 = scmp.ge.s32.totalorder %s1222_s24, 6   ;;  %s1393_s18 = smov %s1154_s19 }
 0x302   : > { %s1394_s19 = smov %s1158_s20  ;;  %s1395_s20 = smov %s1233_s27 }
 0x303   : > { %s1396_s21 = smov %s1222_s24  ;;  %17 = sbr.rel (!%p15_p3) target bundleno = 3 (0x3), region = 78 }
 0x30a   :  { %844 = vsyncpa [#allocation3], 1 }
 0x30b   :  { %846 = vsyncpa [#allocation3 + $0x1], 1 }

</bundles_post_ra>
